<compile_context>
chip_gen: v7x
topology: tpu7x:2x2x1
jax: 0.10.0
libtpu: 0.0.40
codegen_flags: <defaults>
</compile_context>

<pallas_src>
import functools

import jax
import jax.numpy as jnp
import numpy as np
from jax.experimental import pallas as pl
from jax.experimental.pallas import tpu as pltpu


def _choose_row_tile(B, C, block_rows, in_itemsize):
    """Row tile: multiple of 8 (or the full B), keeping blocks+temps <= ~36 MiB."""
    vmem_budget = 36 * 1024 * 1024
    # 2 double-buffered logits blocks + 2 lane-padded (tm,1)->(tm,128) target
    # blocks + ~4 f32-sized intermediates.
    per_row = C * (2 * in_itemsize + 4 * 4) + 2 * 128 * 4
    cap = max(8, vmem_budget // per_row)
    tm = min(int(block_rows), int(cap))
    if tm >= B:
        return B                      # full-extent block: allowed for any B
    return max(8, (tm // 8) * 8)      # otherwise respect the (8, 128) sublane rule


def _nc_loss_kernel(logits_ref, tgt_ref, ce_ref, sq_ref, *, B, C, tm, tiles_per_core):
    c = pl.program_id(0)              # core split ("parallel")
    i = pl.program_id(1)              # batch tiles per core ("arbitrary" reduction)

    @pl.when(i == 0)
    def _():
        ce_ref[...] = jnp.zeros_like(ce_ref)
        sq_ref[...] = jnp.zeros_like(sq_ref)

    x = logits_ref[...].astype(jnp.float32)                    # [tm, C], upcast in-kernel
    tgt = tgt_ref[...]                                         # [tm, 1] int32

    # Global row index for each row of this (possibly clamped / partial) tile.
    tile_idx = c * tiles_per_core + i
    row = tile_idx * tm + jax.lax.broadcasted_iota(jnp.int32, (tm, 1), 0)
    valid = row < B                                            # [tm, 1] bool
    validf = valid.astype(jnp.float32)

    # Zero invalid rows before the exp: padded / clamped-duplicate rows may hold
    # arbitrary data (incl. NaN/Inf).
    x = jnp.where(valid, x, 0.0)

    # Numerically stable softmax statistics over the class axis.
    m = jnp.max(x, axis=1, keepdims=True)                      # [tm, 1]
    e = jnp.exp(x - m)                                         # [tm, C] (EUP)
    s = jnp.sum(e, axis=1, keepdims=True)                      # [tm, 1]
    inv_s = 1.0 / s                                            # one divide per row

    # Cross entropy per row: logsumexp(x) - x[target]; target picked via a
    # broadcast (1, C) iota compare (no materialized [tm, C] iota / one-hot).
    lse = jnp.log(s) + m
    cls = jax.lax.broadcasted_iota(jnp.int32, (1, C), 1)
    tgt_logit = jnp.sum(jnp.where(cls == tgt, x, 0.0), axis=1, keepdims=True)
    ce_rows = (lse - tgt_logit) * validf

    # Nuclear-norm contribution: ||softmax(x_r)||^2 = sum(e^2) / s^2
    # (softmax tile itself is never materialized).
    sq_rows = jnp.sum(e * e, axis=1, keepdims=True) * (inv_s * inv_s) * validf

    # Scalar accumulate, broadcast over the whole (1, 8, 128) resident block
    # (avoids single-element VMEM stores); wrapper reads element [c, 0, 0].
    ce_ref[...] += jnp.sum(ce_rows)
    sq_ref[...] += jnp.sum(sq_rows)


def nc_loss_forward(logits, targets, tau=0.5, weight=None, block_rows=1024):
    """Pallas forward of NCLoss (weight=None path). Returns (loss, ce)."""
    if weight is not None:
        # TODO(synk): class-reweighted path (weighted CE + P_hat = (pred*w) @ pred.T) not implemented.
        raise NotImplementedError("NCLoss weight != None path not implemented")

    B, C = logits.shape
    in_itemsize = logits.dtype.itemsize
    tm = _choose_row_tile(B, C, block_rows, in_itemsize)
    num_tiles = -(-B // tm)                          # cdiv
    num_cores = 2 if num_tiles >= 2 else 1           # v7x: 2 TCs; serial no-op elsewhere
    tiles_per_core = -(-num_tiles // num_cores)
    last_tile = num_tiles - 1

    targets2d = targets.astype(jnp.int32).reshape(B, 1)

    def tile_map(c, i):
        # Clamp so the second core's trailing (fully masked) tiles stay in bounds.
        return (jnp.minimum(c * tiles_per_core + i, last_tile), 0)

    kernel = functools.partial(
        _nc_loss_kernel, B=B, C=C, tm=tm, tiles_per_core=tiles_per_core)

    acc_shape = jax.ShapeDtypeStruct((num_cores, 8, 128), jnp.float32)
    acc_spec = pl.BlockSpec((1, 8, 128), lambda c, i: (c, 0, 0))

    vmem_need = (2 * tm * C * in_itemsize            # double-buffered logits blocks
                 + 2 * tm * 128 * 4                  # target blocks (lane-padded)
                 + 4 * tm * C * 4                    # f32 intermediates
                 + 2 * num_cores * 8 * 128 * 4)      # accumulator blocks
    vmem_limit = int(max(16 << 20, min(48 << 20, vmem_need * 3 // 2)))

    ce_out, sq_out = pl.pallas_call(
        kernel,
        out_shape=(acc_shape, acc_shape),
        grid=(num_cores, tiles_per_core),
        in_specs=[
            pl.BlockSpec((tm, C), tile_map),
            pl.BlockSpec((tm, 1), tile_map),
        ],
        out_specs=(acc_spec, acc_spec),
        compiler_params=pltpu.CompilerParams(
            dimension_semantics=("parallel", "arbitrary"),
            vmem_limit_bytes=vmem_limit),
        cost_estimate=pl.CostEstimate(
            flops=6 * B * C,
            transcendentals=B * C,
            bytes_accessed=B * C * in_itemsize + B * 4),
    )(logits, targets2d)

    ce_sum = jnp.sum(ce_out[:, 0, 0])
    sq_sum = jnp.sum(sq_out[:, 0, 0])
    ce = ce_sum / B
    nc = sq_sum / B
    loss = (1.0 - tau) * ce + tau * nc
    return loss, ce


def _reference(logits, targets, tau=0.5):
    # Faithful numpy reference of the PyTorch module (weight=None path),
    # including the explicit Gram matmul + SVD nuclear norm, in float64.
    x = np.asarray(logits, dtype=np.float64)
    t = np.asarray(targets)
    B = x.shape[0]
    m = x.max(axis=1, keepdims=True)
    e = np.exp(x - m)
    s = e.sum(axis=1, keepdims=True)
    lse = np.log(s) + m
    ce = float(np.mean(lse[:, 0] - x[np.arange(B), t]))
    pred = e / s
    phat = pred @ pred.T
    nc = float(np.linalg.svd(phat, compute_uv=False).sum()) / B
    return (1.0 - tau) * ce + tau * nc, ce


if __name__ == "__main__":
    key = jax.random.PRNGKey(0)
    k1, k2, k3, k4 = jax.random.split(key, 4)
    tau = 0.5

    # Case 1: single full-extent tile (B multiple of 8).
    B, C = 8, 32
    logits = jax.random.normal(k1, (B, C), dtype=jnp.float32)
    targets = jax.random.randint(k2, (B,), 0, C, dtype=jnp.int32)
    loss, ce = jax.block_until_ready(nc_loss_forward(logits, targets, tau=tau))
    ref_loss, ref_ce = _reference(logits, targets, tau=tau)
    assert np.allclose(loss, ref_loss, atol=1e-4, rtol=1e-4), (loss, ref_loss)
    assert np.allclose(ce, ref_ce, atol=1e-4, rtol=1e-4), (ce, ref_ce)

    # Case 2: ragged batch, multi-tile grid, 2-way core split with a clamped,
    # fully-masked duplicate tile on the second core (B=20, tm=8 -> 3 tiles).
    B2, C2 = 20, 48
    logits2 = jax.random.normal(k3, (B2, C2), dtype=jnp.float32)
    targets2 = jax.random.randint(k4, (B2,), 0, C2, dtype=jnp.int32)
    loss2, ce2 = jax.block_until_ready(
        nc_loss_forward(logits2, targets2, tau=tau, block_rows=8))
    ref_loss2, ref_ce2 = _reference(logits2, targets2, tau=tau)
    assert np.allclose(loss2, ref_loss2, atol=1e-4, rtol=1e-4), (loss2, ref_loss2)
    assert np.allclose(ce2, ref_ce2, atol=1e-4, rtol=1e-4), (ce2, ref_ce2)

    # Case 3: ragged full-extent tile (B not a multiple of 8, default tiling) with
    # native bf16 logits -- upcast happens inside the kernel, no host pass.
    logits3 = logits2.astype(jnp.bfloat16)
    loss3, ce3 = jax.block_until_ready(nc_loss_forward(logits3, targets2, tau=tau))
    ref_loss3, ref_ce3 = _reference(np.asarray(logits3.astype(jnp.float32)),
                                    targets2, tau=tau)
    assert np.allclose(loss3, ref_loss3, atol=1e-3, rtol=1e-3), (loss3, ref_loss3)
    assert np.allclose(ce3, ref_ce3, atol=1e-3, rtol=1e-3), (ce3, ref_ce3)

    print("KERNEL_OK")
</pallas_src>

<mosaic_0001>
module attributes {stable_mosaic.version = 11 : i64} {
  func.func @_nc_loss_kernel(%arg0: i32, %arg1: i32, %arg2: memref<8x32xf32, #tpu.memory_space<vmem>>, %arg3: memref<8x1xi32, #tpu.memory_space<vmem>>, %arg4: memref<1x8x128xf32, #tpu.memory_space<vmem>>, %arg5: memref<1x8x128xf32, #tpu.memory_space<vmem>>) attributes {dimension_semantics = [#tpu.dimension_semantics<parallel>, #tpu.dimension_semantics<arbitrary>], iteration_bounds = array<i64: 1, 1>, scalar_prefetch = 0 : i64, scratch_operands = 0 : i64, tpu.core_type = #tpu.core_type<tc>, window_params = [{transform_indices = @transform_0, window_bounds = array<i64: 8, 32>}, {transform_indices = @transform_1, window_bounds = array<i64: 8, 1>}, {transform_indices = @transform_2, window_bounds = array<i64: 1, 8, 128>}, {transform_indices = @transform_3, window_bounds = array<i64: 1, 8, 128>}]} {
    %c0_i32 = arith.constant 0 : i32
    %0 = arith.cmpi eq, %arg1, %c0_i32 : i32
    %1 = arith.extui %0 : i1 to i32
    %c0_i32_0 = arith.constant 0 : i32
    %2 = arith.cmpi ne, %1, %c0_i32_0 : i32
    scf.if %2 {
      %cst_25 = arith.constant 0.000000e+00 : f32
      %62 = vector.broadcast %cst_25 : f32 to vector<1x8x128xf32>
      %c0_26 = arith.constant 0 : index
      %c0_27 = arith.constant 0 : index
      %c0_28 = arith.constant 0 : index
      %63 = vector.load %arg4[%c0_26, %c0_27, %c0_28] : memref<1x8x128xf32, #tpu.memory_space<vmem>>, vector<1x8x128xf32>
      tpu.vector_store %arg4[%c0_26, %c0_27, %c0_28], %62 {strides = array<i32>} : memref<1x8x128xf32, #tpu.memory_space<vmem>>, vector<1x8x128xf32>,
      %cst_29 = arith.constant 0.000000e+00 : f32
      %64 = vector.broadcast %cst_29 : f32 to vector<1x8x128xf32>
      %c0_30 = arith.constant 0 : index
      %c0_31 = arith.constant 0 : index
      %c0_32 = arith.constant 0 : index
      %65 = vector.load %arg5[%c0_30, %c0_31, %c0_32] : memref<1x8x128xf32, #tpu.memory_space<vmem>>, vector<1x8x128xf32>
      tpu.vector_store %arg5[%c0_30, %c0_31, %c0_32], %64 {strides = array<i32>} : memref<1x8x128xf32, #tpu.memory_space<vmem>>, vector<1x8x128xf32>,
    } else {
    }
    %c0 = arith.constant 0 : index
    %c0_1 = arith.constant 0 : index
    %3 = vector.load %arg2[%c0, %c0_1] : memref<8x32xf32, #tpu.memory_space<vmem>>, vector<8x32xf32>
    %c0_2 = arith.constant 0 : index
    %c0_3 = arith.constant 0 : index
    %4 = vector.load %arg3[%c0_2, %c0_3] : memref<8x1xi32, #tpu.memory_space<vmem>>, vector<8x1xi32>
    %c1_i32 = arith.constant 1 : i32
    %5 = arith.muli %arg0, %c1_i32 : i32
    %6 = arith.addi %5, %arg1 : i32
    %c8_i32 = arith.constant 8 : i32
    %7 = arith.muli %6, %c8_i32 : i32
    %8 = tpu.iota {dimensions = array<i32: 0>} : vector<8x1xi32>
    %9 = vector.broadcast %7 : i32 to vector<8x1xi32>
    %10 = arith.addi %9, %8 : vector<8x1xi32>
    %c8_i32_4 = arith.constant 8 : i32
    %11 = vector.broadcast %c8_i32_4 : i32 to vector<8x1xi32>
    %12 = arith.cmpi slt, %10, %11 : vector<8x1xi32>
    %13 = arith.extui %12 : vector<8x1xi1> to vector<8x1xi32>
    %14 = arith.sitofp %13 : vector<8x1xi32> to vector<8x1xf32>
    %cst = arith.constant 0.000000e+00 : f32
    %15 = vector.shape_cast %12 : vector<8x1xi1> to vector<8x1xi1>
    %16 = vector.broadcast %15 : vector<8x1xi1> to vector<8x32xi1>
    %17 = vector.broadcast %cst : f32 to vector<8x32xf32>
    %18 = arith.select %16, %3, %17 : vector<8x32xi1>, vector<8x32xf32>
    %cst_5 = arith.constant dense<0xFF800000> : vector<8xf32>
    %19 = vector.multi_reduction <maximumf>, %18, %cst_5 [1] : vector<8x32xf32> to vector<8xf32>
    %20 = vector.shape_cast %19 : vector<8xf32> to vector<8x1xf32>
    %21 = vector.broadcast %20 : vector<8x1xf32> to vector<8x32xf32>
    %22 = arith.subf %18, %21 : vector<8x32xf32>
    %23 = math.exp %22 : vector<8x32xf32>
    %cst_6 = arith.constant dense<0.000000e+00> : vector<8xf32>
    %24 = vector.multi_reduction <add>, %23, %cst_6 [1] : vector<8x32xf32> to vector<8xf32>
    %25 = vector.shape_cast %24 : vector<8xf32> to vector<8x1xf32>
    %cst_7 = arith.constant 1.000000e+00 : f32
    %26 = vector.broadcast %cst_7 : f32 to vector<8x1xf32>
    %27 = arith.divf %26, %25 : vector<8x1xf32>
    %28 = math.log %25 : vector<8x1xf32>
    %29 = arith.addf %28, %20 : vector<8x1xf32>
    %30 = tpu.iota {dimensions = array<i32: 1>} : vector<1x32xi32>
    %31 = vector.broadcast %30 : vector<1x32xi32> to vector<8x32xi32>
    %32 = vector.broadcast %4 : vector<8x1xi32> to vector<8x32xi32>
    %33 = arith.cmpi eq, %31, %32 : vector<8x32xi32>
    %cst_8 = arith.constant 0.000000e+00 : f32
    %34 = vector.broadcast %cst_8 : f32 to vector<8x32xf32>
    %35 = arith.select %33, %18, %34 : vector<8x32xi1>, vector<8x32xf32>
    %cst_9 = arith.constant dense<0.000000e+00> : vector<8xf32>
    %36 = vector.multi_reduction <add>, %35, %cst_9 [1] : vector<8x32xf32> to vector<8xf32>
    %37 = vector.shape_cast %36 : vector<8xf32> to vector<8x1xf32>
    %38 = arith.subf %29, %37 : vector<8x1xf32>
    %39 = arith.mulf %38, %14 : vector<8x1xf32>
    %40 = arith.mulf %23, %23 : vector<8x32xf32>
    %cst_10 = arith.constant dense<0.000000e+00> : vector<8xf32>
    %41 = vector.multi_reduction <add>, %40, %cst_10 [1] : vector<8x32xf32> to vector<8xf32>
    %42 = vector.shape_cast %41 : vector<8xf32> to vector<8x1xf32>
    %43 = arith.mulf %27, %27 : vector<8x1xf32>
    %44 = arith.mulf %42, %43 : vector<8x1xf32>
    %45 = arith.mulf %44, %14 : vector<8x1xf32>
    %c0_11 = arith.constant 0 : index
    %c0_12 = arith.constant 0 : index
    %c0_13 = arith.constant 0 : index
    %46 = vector.load %arg4[%c0_11, %c0_12, %c0_13] : memref<1x8x128xf32, #tpu.memory_space<vmem>>, vector<1x8x128xf32>
    %47 = vector.shape_cast %39 : vector<8x1xf32> to vector<1x8x1xf32>
    %cst_14 = arith.constant dense<0.000000e+00> : vector<1xf32>
    %48 = vector.multi_reduction <add>, %47, %cst_14 [1, 2] : vector<1x8x1xf32> to vector<1xf32>
    %49 = vector.shape_cast %48 : vector<1xf32> to vector<1x1x1xf32>
    %50 = vector.extract %49[0, 0, 0] : f32 from vector<1x1x1xf32>
    %51 = vector.broadcast %50 : f32 to vector<1x8x128xf32>
    %52 = arith.addf %46, %51 : vector<1x8x128xf32>
    %c0_15 = arith.constant 0 : index
    %c0_16 = arith.constant 0 : index
    %c0_17 = arith.constant 0 : index
    %53 = vector.load %arg4[%c0_15, %c0_16, %c0_17] : memref<1x8x128xf32, #tpu.memory_space<vmem>>, vector<1x8x128xf32>
    tpu.vector_store %arg4[%c0_15, %c0_16, %c0_17], %52 {strides = array<i32>} : memref<1x8x128xf32, #tpu.memory_space<vmem>>, vector<1x8x128xf32>,
    %c0_18 = arith.constant 0 : index
    %c0_19 = arith.constant 0 : index
    %c0_20 = arith.constant 0 : index
    %54 = vector.load %arg5[%c0_18, %c0_19, %c0_20] : memref<1x8x128xf32, #tpu.memory_space<vmem>>, vector<1x8x128xf32>
    %55 = vector.shape_cast %45 : vector<8x1xf32> to vector<1x8x1xf32>
    %cst_21 = arith.constant dense<0.000000e+00> : vector<1xf32>
    %56 = vector.multi_reduction <add>, %55, %cst_21 [1, 2] : vector<1x8x1xf32> to vector<1xf32>
    %57 = vector.shape_cast %56 : vector<1xf32> to vector<1x1x1xf32>
    %58 = vector.extract %57[0, 0, 0] : f32 from vector<1x1x1xf32>
    %59 = vector.broadcast %58 : f32 to vector<1x8x128xf32>
    %60 = arith.addf %54, %59 : vector<1x8x128xf32>
    %c0_22 = arith.constant 0 : index
    %c0_23 = arith.constant 0 : index
    %c0_24 = arith.constant 0 : index
    %61 = vector.load %arg5[%c0_22, %c0_23, %c0_24] : memref<1x8x128xf32, #tpu.memory_space<vmem>>, vector<1x8x128xf32>
    tpu.vector_store %arg5[%c0_22, %c0_23, %c0_24], %60 {strides = array<i32>} : memref<1x8x128xf32, #tpu.memory_space<vmem>>, vector<1x8x128xf32>,
    return
  }
  func.func @transform_0(%arg0: i32, %arg1: i32) -> (i32, i32) {
    %c1_i32 = arith.constant 1 : i32
    %0 = arith.muli %arg0, %c1_i32 : i32
    %1 = arith.addi %0, %arg1 : i32
    %c0_i32 = arith.constant 0 : i32
    %2 = arith.minsi %1, %c0_i32 : i32
    %c0_i32_0 = arith.constant 0 : i32
    %c0_i32_1 = arith.constant 0 : i32
    return %2, %c0_i32_0 : i32, i32
  }
  func.func @transform_1(%arg0: i32, %arg1: i32) -> (i32, i32) {
    %c1_i32 = arith.constant 1 : i32
    %0 = arith.muli %arg0, %c1_i32 : i32
    %1 = arith.addi %0, %arg1 : i32
    %c0_i32 = arith.constant 0 : i32
    %2 = arith.minsi %1, %c0_i32 : i32
    %c0_i32_0 = arith.constant 0 : i32
    %c0_i32_1 = arith.constant 0 : i32
    return %2, %c0_i32_0 : i32, i32
  }
  func.func @transform_2(%arg0: i32, %arg1: i32) -> (i32, i32, i32) {
    %c0_i32 = arith.constant 0 : i32
    %c0_i32_0 = arith.constant 0 : i32
    %c0_i32_1 = arith.constant 0 : i32
    return %arg0, %c0_i32, %c0_i32_0 : i32, i32, i32
  }
  func.func @transform_3(%arg0: i32, %arg1: i32) -> (i32, i32, i32) {
    %c0_i32 = arith.constant 0 : i32
    %c0_i32_0 = arith.constant 0 : i32
    %c0_i32_1 = arith.constant 0 : i32
    return %arg0, %c0_i32, %c0_i32_0 : i32, i32, i32
  }
}

</mosaic_0001>

<bundles_post_ra>
// kernel: tpu_custom_call.1
= control target key start
LH: loop header
LB: loop body
LE: loop exit
PB: predicated region body
PF: predicated region fallthrough
CT: control target
= control target key end

     0   :  { %9 = vsyncpa [#allocation3], 0  ;;  %vm88_vm0 = vcmask 261120   ;;  %s311_s0 = inlined_call_operand.vmem [shape: f32[8,32], index: 0, kind: input, shape index: {}]   ;;  %s312_s1 = inlined_call_operand.vmem [shape: s32[8,1], index: 1, kind: input, shape index: {}]   ;;  %s313_s2 = inlined_call_operand.hbm [shape: f32[1,8,128], index: 2, kind: output, shape index: {0}]   ;;  %s314_s3 = inlined_call_operand.hbm [shape: f32[1,8,128], index: 3, kind: output, shape index: {1}]  }
   0x1   :  { %v75_v0 = vld [vmem:[%s311_s0] sm:$0xff] }
   0x2   :  { %10 = vsyncpa [#allocation5], 0  ;;  %v89_v1 = vsel %vm88_vm0, %v75_v0, -inf  ;;  %v254_v2 = vmov 0   ;;  %v76_v3 = vld [vmem:[%s312_s1] sm:$0xff]  ;;  %v103_v7 = vlaneseq  ;;  %vm123_vm2 = vcmask 7168  }
   0x3   :  { %199 = vset.pattern.permute.xlu0 %v254_v2  ;;  %s255_s0 = smov [#allocation2]   ;;  %s256_s17 = smov [#allocation4]  }
   0x4   :  { %90 = vmax.xlane.f32.xlu0 %v89_v1  ;;  %v104_v8 = vand.u32 127, %v103_v7  ;;  %s157_s1 = sshll.u32 %s255_s0, 4  ;;  %s167_s18 = sshll.u32 %s256_s17, 4  ;;  %s158_s1 = int_to_ptr.vmem [resolvable:$true] %s157_s1  ;;  %s168_s18 = int_to_ptr.vmem [resolvable:$true] %s167_s18 }
   0x5   :  { %s206_s20 = scalar_lea.vmem %s158_s1, 128  ;;  %p211_p1 = scmp.lt.s32.totalorder %s158_s1, %s158_s1 }
   0x6   :  { %p207_p0 = scmp.ne.s32.totalorder %s158_s1, %s206_s20  ;;  %p212_p2 = scmp.lt.s32.totalorder %s206_s20, %s206_s20 }
   0x8   :  { %p213_p3 = por %p212_p2, %p211_p1 }
   0xa   :  { %p214_p4 = pnand %p213_p3, %p207_p0 }
  0x1a   :  { %106 = vperm.xlu0 %199, %v76_v3  }
  0x91   :  { %v91_v4 = vpop.xlane.xlu0 %90 }
  0x92   :  { %v92_v5 = vsub.f32 %v75_v0, %v91_v4 }
  0x94   :  { %v93_v6 = vmul.f32 1.442695, %v92_v5 }
  0x96   :  { %200 = vpow2.f32 %v93_v6 }
  0x99   :  { %v107_v9 = vpop.permute.xlu0 %106 }
  0x9a   :  { %vm108_vm1 = vcmp.eq.s32.totalorder %v104_v8, %v107_v9 }
  0x9b   :  { %v109_v11 = vsel %vm108_vm1, %v75_v0, 0.0 }
  0x9c   :  { %v110_v13 = vsel %vm88_vm0, %v109_v11, 0.0 }
  0xa0   :  { %v201_v10 = vpop.eup %200 }
  0xa1   :  { %v95_v12 = vsel %vm88_vm0, %v201_v10, 0.0  ;;  %v115_v14 = vmul.f32 %v201_v10, %v201_v10 }
  0xa2   :  { %96 = vadd.xlane.f32.xlu1 %v95_v12 }
  0xa3   :  { %v116_v15 = vsel %vm88_vm0, %v115_v14, 0.0 }
  0xa6   :  { %111 = vadd.xlane.f32.xlu1 %v110_v13 }
  0xaa   :  { %117 = vadd.xlane.f32.xlu1 %v116_v15 }
 0x12f   :  { %v97_v16 = vpop.xlane.xlu1 %96 }
 0x130   :  { %202 = vrcp.f32 %v97_v16 }
 0x131   :  { %204 = vlog2.f32 %v97_v16 }
 0x133   :  { %v112_v19 = vpop.xlane.xlu1 %111 }
 0x137   :  { %v118_v24 = vpop.xlane.xlu1 %117 }
 0x13a   :  { %v203_v17 = vpop.eup %202 }
 0x13b   :  { %v205_v18 = vpop.eup %204  ;;  %v119_v22 = vmul.f32 %v203_v17, %v203_v17 }
 0x13c   :  { %v101_v20 = vmul.f32 0.6931472, %v205_v18 }
 0x13d   :  { %v120_v25 = vmul.f32 %v119_v22, %v118_v24 }
 0x13e   :  { %v102_v21 = vadd.f32 %v101_v20, %v91_v4 }
 0x13f   :  { %v138_v27 = vsel %vm123_vm2, %v120_v25, 0.0 }
 0x140   :  { %v113_v23 = vsub.f32 %v102_v21, %v112_v19 }
 0x142   :  { %v124_v26 = vsel %vm123_vm2, %v113_v23, 0.0 }
 0x143   :  { %125 = vadd.xlane.f32.xlu1 %v124_v26 }
 0x147   :  { %139 = vadd.xlane.f32.xlu1 %v138_v27 }
 0x1d0   :  { %v126_v28 = vpop.xlane.xlu1 %125 }
 0x1d1   :  { %v127_v29 = vrot.slane %v126_v28, 4 }
 0x1d3   :  { %v128_v30 = vadd.f32 %v127_v29, %v126_v28 }
 0x1d4   :  { %v140_v31 = vpop.xlane.xlu1 %139 }
 0x1d5   :  { %v129_v32 = vrot.slane %v128_v30, 2  ;;  %v141_v33 = vrot.slane %v140_v31, 4 }
 0x1d7   :  { %v142_v34 = vadd.f32 %v141_v33, %v140_v31  ;;  %v130_v35 = vadd.f32 %v129_v32, %v128_v30 }
 0x1d9   :  { %v143_v36 = vrot.slane %v142_v34, 2  ;;  %v131_v37 = vrot.slane %v130_v35, 1 }
 0x1db   :  { %v144_v38 = vadd.f32 %v143_v36, %v142_v34  ;;  %v132_v39 = vadd.f32 %v131_v37, %v130_v35 }
 0x1dd   :  { %191 = vpush %v132_v39  ;;  %v145_v40 = vrot.slane %v144_v38, 1 }
 0x1df   :  { %v146_v41 = vadd.f32 %v145_v40, %v144_v38 }
 0x1e1   :  { %193 = vpush %v146_v41 }
 0x20e   :  { %s192_s16 = spop %191 }
 0x20f   :  { %v134_v42 = vstv %s192_s16 }
 0x210   :  { %136 = vst [vmem:[#allocation2] sm:$0xff] %v134_v42 }
 0x212   :  { %s194_s19 = spop %193 }
 0x213   :  { %v148_v43 = vstv %s194_s19 }
 0x214   :  { %217 = shalt.err (!%p214_p4)
}
 0x215   :  { %s218_s23 = scalar_lea.hbm %s313_s2, 128 }
 0x216   :  { %p219_p5 = scmp.ne.s32.totalorder %s313_s2, %s218_s23  ;;  %p222_p6 = scmp.lt.u32.totalorder %s218_s23, %s313_s2 }
 0x218   :  { %p224_p7 = pnand %p222_p6, %p219_p5 }
 0x21a   :  { %227 = shalt.err (!%p224_p7)
}
 0x21b   :  { %160 = dma.vmem_to_hbm [thread:$0]  %s158_s1, 128, %s313_s2, [#allocation3]   ;;  %150 = vst [vmem:[#allocation4] sm:$0xff] %v148_v43 }
 0x21c   :  { %s228_s30 = scalar_lea.vmem %s168_s18, 128  ;;  %p233_p9 = scmp.lt.s32.totalorder %s168_s18, %s168_s18 }
 0x21d   :  { %p229_p8 = scmp.ne.s32.totalorder %s168_s18, %s228_s30  ;;  %p234_p10 = scmp.lt.s32.totalorder %s228_s30, %s228_s30 }
 0x21f   :  { %p235_p11 = por %p234_p10, %p233_p9 }
 0x221   :  { %p236_p12 = pnand %p235_p11, %p229_p8 }
 0x223   :  { %239 = shalt.err (!%p236_p12)
}
 0x224   :  { %s240_s6 = scalar_lea.hbm %s314_s3, 128 }
 0x225   :  { %p241_p13 = scmp.ne.s32.totalorder %s314_s3, %s240_s6  ;;  %p244_p0 = scmp.lt.u32.totalorder %s240_s6, %s314_s3 }
 0x227   :  { %p246_p1 = pnand %p244_p0, %p241_p13 }
 0x229   :  { %249 = shalt.err (!%p246_p1)
}
 0x22a   :  { %170 = dma.vmem_to_hbm [thread:$0]  %s168_s18, 128, %s314_s3, [#allocation5]  }
 0x22b   :  { %250 = dma.done.wait [#allocation3], 128  }
 0x22c   :  { %251 = vsyncadd [#allocation3], 4294967168 }
 0x22d   :  { %252 = dma.done.wait [#allocation5], 128  }
 0x22e   :  { %253 = vsyncadd [#allocation5], 4294967168 }
 0x22f   :  { %177 = vsyncpa [#allocation3], 1 }
 0x230   :  { %178 = vsyncpa [#allocation5], 1 }

</bundles_post_ra>
